<compile_context>
chip_gen: v7x
topology: tpu7x:2x2x1
jax: 0.10.0
libtpu: 0.0.40
codegen_flags: <defaults>
</compile_context>

<pallas_src>
import jax
import jax.numpy as jnp
from jax.experimental import pallas as pl
from jax.experimental.pallas import tpu as pltpu


def _round_up(n, m):
    return ((n + m - 1) // m) * m


def mlp_kernel(x_ref, w1_ref, b1_ref, w2_ref, b2_ref,
               w3_ref, b3_ref, w4_ref, b4_ref, o_ref):
    # Hidden layers: chained MXU matmuls (f32 accumulation) + VPU bias/ReLU in VMEM.
    h = jnp.dot(x_ref[...], w1_ref[...], preferred_element_type=jnp.float32)
    h = jnp.maximum(h + b1_ref[...], 0.0)
    h = jnp.dot(h.astype(w2_ref.dtype), w2_ref[...],
                preferred_element_type=jnp.float32)
    h = jnp.maximum(h + b2_ref[...], 0.0)
    h = jnp.dot(h.astype(w3_ref.dtype), w3_ref[...],
                preferred_element_type=jnp.float32)
    h = jnp.maximum(h + b3_ref[...], 0.0)
    # Final layer (out_features == 1): multiply + lane reduce on VPU/XLU instead of
    # a 1-column MXU matmul; the result is written lane-dense as a (1, tile_b) row.
    v = jnp.sum(h * w4_ref[...].astype(jnp.float32), axis=-1)          # (tile_b,)
    o_ref[...] = (v[None, :] + b4_ref[...].astype(jnp.float32)).astype(o_ref.dtype)


def value_model_forward(x, params, *, tile_b=256, use_bf16=False):
    """x: [B, D_in] float32. params: list of (W[in, out], b[1, out]).

    Returns [B, 1] float32, matching ValueModel.forward.
    """
    B, D_in = x.shape
    (w1, b1), (w2, b2), (w3, b3), (w4, b4) = params

    # Zero-pad the input feature dim to a lane multiple (exact result).
    D_pad = _round_up(D_in, 128)
    if D_pad != D_in:
        x = jnp.pad(x, ((0, 0), (0, D_pad - D_in)))
        w1 = jnp.pad(w1, ((0, D_pad - D_in), (0, 0)))

    # Batch tiling: large tiles fill the MXU M dim and amortize per-step cost.
    B8 = _round_up(B, 8)
    if B8 <= tile_b:
        tile_b = B8                      # single grid step; block == full dim
    else:
        assert tile_b % 128 == 0, "tile_b must be a multiple of 128"
    B_pad = _round_up(B, tile_b)
    if B_pad != B:
        x = jnp.pad(x, ((0, B_pad - B), (0, 0)))  # padded rows sliced off below

    # Final layer weight as a (1, hidden_last) row for the in-kernel reduce.
    w4_row = w4.T

    if use_bf16:
        # bf16 MXU operands (v6e/v7x fast path), f32 accumulation in-kernel.
        x = x.astype(jnp.bfloat16)
        w1, w2, w3, w4_row = (a.astype(jnp.bfloat16) for a in (w1, w2, w3, w4_row))

    grid = (B_pad // tile_b,)

    def invariant_spec(arr):
        # Grid-invariant full-array block (weights / biases).
        return pl.BlockSpec(arr.shape, lambda i: (0,) * arr.ndim)

    x_spec = pl.BlockSpec((tile_b, D_pad), lambda i: (i, 0))
    # Lane-dense output: one (1, tile_b) block per step into a (1, B_pad) slab.
    o_spec = pl.BlockSpec((1, tile_b), lambda i: (0, i))

    out = pl.pallas_call(
        mlp_kernel,
        out_shape=jax.ShapeDtypeStruct((1, B_pad), jnp.float32),
        grid_spec=pltpu.PrefetchScalarGridSpec(
            num_scalar_prefetch=0,
            grid=grid,
            in_specs=[x_spec,
                      invariant_spec(w1), invariant_spec(b1),
                      invariant_spec(w2), invariant_spec(b2),
                      invariant_spec(w3), invariant_spec(b3),
                      invariant_spec(w4_row), invariant_spec(b4)],
            out_specs=o_spec,
        ),
        compiler_params=pltpu.CompilerParams(
            dimension_semantics=("parallel",)),
    )(x, w1, b1, w2, b2, w3, b3, w4_row, b4)

    return out.reshape(B_pad, 1)[:B]


def init_params(key, input_shape, hidden_units=(256, 128, 64)):
    """Deterministic init mirroring nn.Linear defaults (uniform +-1/sqrt(fan_in))."""
    params = []
    dims = [input_shape] + list(hidden_units) + [1]
    for fan_in, fan_out in zip(dims[:-1], dims[1:]):
        key, kw, kb = jax.random.split(key, 3)
        bound = 1.0 / jnp.sqrt(jnp.float32(fan_in))
        w = jax.random.uniform(kw, (fan_in, fan_out), jnp.float32, -bound, bound)
        b = jax.random.uniform(kb, (1, fan_out), jnp.float32, -bound, bound)
        params.append((w, b))
    return params


def reference_forward(x, params):
    h = x
    for w, b in params[:-1]:
        h = jnp.maximum(h @ w + b, 0.0)
    w, b = params[-1]
    return h @ w + b


if __name__ == "__main__":
    key = jax.random.PRNGKey(0)
    key, kx1, kx2 = jax.random.split(key, 3)

    D_in = 32
    params = init_params(key, D_in, hidden_units=(256, 128, 64))

    # 1) Small, non-multiple-of-8 batch (single grid step, clamped tile, wrapper pad).
    x_small = jax.random.normal(kx1, (13, D_in), jnp.float32)
    out_small = jax.block_until_ready(value_model_forward(x_small, params))
    ref_small = reference_forward(x_small, params)
    assert out_small.shape == (13, 1)
    assert jnp.allclose(out_small, ref_small, atol=1e-5, rtol=1e-5), "small-batch mismatch"

    # 2) Larger batch exercising a multi-step grid and lane-dense stores.
    x_big = jax.random.normal(kx2, (384, D_in), jnp.float32)
    out_big = jax.block_until_ready(value_model_forward(x_big, params, tile_b=128))
    ref_big = reference_forward(x_big, params)
    assert out_big.shape == (384, 1)
    assert jnp.allclose(out_big, ref_big, atol=1e-5, rtol=1e-5), "big-batch mismatch"

    # 3) bf16 MXU-operand path (v6e/v7x); f32 accumulation keeps it near the f32 ref.
    out_bf16 = jax.block_until_ready(
        value_model_forward(x_big, params, tile_b=128, use_bf16=True))
    assert out_bf16.shape == (384, 1)
    assert bool(jnp.all(jnp.isfinite(out_bf16)))
    assert jnp.allclose(out_bf16, ref_big, atol=1e-1, rtol=1e-1), "bf16 path mismatch"

    print("KERNEL_OK")
</pallas_src>

<mosaic_0001>
module attributes {stable_mosaic.version = 11 : i64} {
  func.func @mlp_kernel(%arg0: i32, %arg1: memref<16x128xf32, #tpu.memory_space<vmem>>, %arg2: memref<128x256xf32, #tpu.memory_space<vmem>>, %arg3: memref<1x256xf32, #tpu.memory_space<vmem>>, %arg4: memref<256x128xf32, #tpu.memory_space<vmem>>, %arg5: memref<1x128xf32, #tpu.memory_space<vmem>>, %arg6: memref<128x64xf32, #tpu.memory_space<vmem>>, %arg7: memref<1x64xf32, #tpu.memory_space<vmem>>, %arg8: memref<1x64xf32, #tpu.memory_space<vmem>>, %arg9: memref<1x1xf32, #tpu.memory_space<vmem>>, %arg10: memref<1x16xf32, #tpu.memory_space<vmem>>) attributes {dimension_semantics = [#tpu.dimension_semantics<parallel>], iteration_bounds = array<i64: 1>, scalar_prefetch = 0 : i64, scratch_operands = 0 : i64, tpu.core_type = #tpu.core_type<tc>, window_params = [{transform_indices = @transform_0, window_bounds = array<i64: 16, 128>}, {pipeline_mode = #tpu.pipeline_mode<synchronous>, transform_indices = @transform_1, window_bounds = array<i64: 128, 256>}, {pipeline_mode = #tpu.pipeline_mode<synchronous>, transform_indices = @transform_2, window_bounds = array<i64: 1, 256>}, {pipeline_mode = #tpu.pipeline_mode<synchronous>, transform_indices = @transform_3, window_bounds = array<i64: 256, 128>}, {pipeline_mode = #tpu.pipeline_mode<synchronous>, transform_indices = @transform_4, window_bounds = array<i64: 1, 128>}, {pipeline_mode = #tpu.pipeline_mode<synchronous>, transform_indices = @transform_5, window_bounds = array<i64: 128, 64>}, {pipeline_mode = #tpu.pipeline_mode<synchronous>, transform_indices = @transform_6, window_bounds = array<i64: 1, 64>}, {pipeline_mode = #tpu.pipeline_mode<synchronous>, transform_indices = @transform_7, window_bounds = array<i64: 1, 64>}, {pipeline_mode = #tpu.pipeline_mode<synchronous>, transform_indices = @transform_8, window_bounds = array<i64: 1, 1>}, {transform_indices = @transform_9, window_bounds = array<i64: 1, 16>}]} {
    %c0 = arith.constant 0 : index
    %c0_0 = arith.constant 0 : index
    %0 = vector.load %arg1[%c0, %c0_0] : memref<16x128xf32, #tpu.memory_space<vmem>>, vector<16x128xf32>
    %c0_1 = arith.constant 0 : index
    %c0_2 = arith.constant 0 : index
    %1 = vector.load %arg2[%c0_1, %c0_2] : memref<128x256xf32, #tpu.memory_space<vmem>>, vector<128x256xf32>
    %cst = arith.constant dense<0.000000e+00> : vector<16x256xf32>
    %2 = tpu.matmul %0, %1, %cst {dimension_numbers = #tpu.dot_dimension_numbers<[1], [0], [0], [1], [0, 0, 1, 1], [], []>} : vector<16x128xf32>, vector<128x256xf32>, vector<16x256xf32> -> vector<16x256xf32>
    %c0_3 = arith.constant 0 : index
    %c0_4 = arith.constant 0 : index
    %3 = vector.load %arg3[%c0_3, %c0_4] : memref<1x256xf32, #tpu.memory_space<vmem>>, vector<1x256xf32>
    %4 = vector.broadcast %3 : vector<1x256xf32> to vector<16x256xf32>
    %5 = arith.addf %2, %4 : vector<16x256xf32>
    %cst_5 = arith.constant 0.000000e+00 : f32
    %6 = vector.broadcast %cst_5 : f32 to vector<16x256xf32>
    %7 = arith.maximumf %5, %6 : vector<16x256xf32>
    %c0_6 = arith.constant 0 : index
    %c0_7 = arith.constant 0 : index
    %8 = vector.load %arg4[%c0_6, %c0_7] : memref<256x128xf32, #tpu.memory_space<vmem>>, vector<256x128xf32>
    %cst_8 = arith.constant dense<0.000000e+00> : vector<16x128xf32>
    %9 = tpu.matmul %7, %8, %cst_8 {dimension_numbers = #tpu.dot_dimension_numbers<[1], [0], [0], [1], [0, 0, 1, 1], [], []>} : vector<16x256xf32>, vector<256x128xf32>, vector<16x128xf32> -> vector<16x128xf32>
    %c0_9 = arith.constant 0 : index
    %c0_10 = arith.constant 0 : index
    %10 = vector.load %arg5[%c0_9, %c0_10] : memref<1x128xf32, #tpu.memory_space<vmem>>, vector<1x128xf32>
    %11 = vector.broadcast %10 : vector<1x128xf32> to vector<16x128xf32>
    %12 = arith.addf %9, %11 : vector<16x128xf32>
    %cst_11 = arith.constant 0.000000e+00 : f32
    %13 = vector.broadcast %cst_11 : f32 to vector<16x128xf32>
    %14 = arith.maximumf %12, %13 : vector<16x128xf32>
    %c0_12 = arith.constant 0 : index
    %c0_13 = arith.constant 0 : index
    %15 = vector.load %arg6[%c0_12, %c0_13] : memref<128x64xf32, #tpu.memory_space<vmem>>, vector<128x64xf32>
    %cst_14 = arith.constant dense<0.000000e+00> : vector<16x64xf32>
    %16 = tpu.matmul %14, %15, %cst_14 {dimension_numbers = #tpu.dot_dimension_numbers<[1], [0], [0], [1], [0, 0, 1, 1], [], []>} : vector<16x128xf32>, vector<128x64xf32>, vector<16x64xf32> -> vector<16x64xf32>
    %c0_15 = arith.constant 0 : index
    %c0_16 = arith.constant 0 : index
    %17 = vector.load %arg7[%c0_15, %c0_16] : memref<1x64xf32, #tpu.memory_space<vmem>>, vector<1x64xf32>
    %18 = vector.broadcast %17 : vector<1x64xf32> to vector<16x64xf32>
    %19 = arith.addf %16, %18 : vector<16x64xf32>
    %cst_17 = arith.constant 0.000000e+00 : f32
    %20 = vector.broadcast %cst_17 : f32 to vector<16x64xf32>
    %21 = arith.maximumf %19, %20 : vector<16x64xf32>
    %c0_18 = arith.constant 0 : index
    %c0_19 = arith.constant 0 : index
    %22 = vector.load %arg8[%c0_18, %c0_19] : memref<1x64xf32, #tpu.memory_space<vmem>>, vector<1x64xf32>
    %23 = vector.broadcast %22 : vector<1x64xf32> to vector<16x64xf32>
    %24 = arith.mulf %21, %23 : vector<16x64xf32>
    %cst_20 = arith.constant dense<0.000000e+00> : vector<16xf32>
    %25 = vector.multi_reduction <add>, %24, %cst_20 [1] : vector<16x64xf32> to vector<16xf32>
    %26 = vector.shape_cast %25 : vector<16xf32> to vector<1x16xf32>
    %c0_21 = arith.constant 0 : index
    %c0_22 = arith.constant 0 : index
    %27 = vector.load %arg9[%c0_21, %c0_22] : memref<1x1xf32, #tpu.memory_space<vmem>>, vector<1x1xf32>
    %28 = vector.broadcast %27 : vector<1x1xf32> to vector<1x16xf32>
    %29 = arith.addf %26, %28 : vector<1x16xf32>
    %c0_23 = arith.constant 0 : index
    %c0_24 = arith.constant 0 : index
    %30 = vector.load %arg10[%c0_23, %c0_24] : memref<1x16xf32, #tpu.memory_space<vmem>>, vector<1x16xf32>
    tpu.vector_store %arg10[%c0_23, %c0_24], %29 {strides = array<i32>} : memref<1x16xf32, #tpu.memory_space<vmem>>, vector<1x16xf32>,
    return
  }
  func.func @transform_0(%arg0: i32) -> (i32, i32) {
    %c0_i32 = arith.constant 0 : i32
    %c0_i32_0 = arith.constant 0 : i32
    return %arg0, %c0_i32 : i32, i32
  }
  func.func @transform_1(%arg0: i32) -> (i32, i32) {
    %c0_i32 = arith.constant 0 : i32
    %c0_i32_0 = arith.constant 0 : i32
    %c0_i32_1 = arith.constant 0 : i32
    return %c0_i32, %c0_i32_0 : i32, i32
  }
  func.func @transform_2(%arg0: i32) -> (i32, i32) {
    %c0_i32 = arith.constant 0 : i32
    %c0_i32_0 = arith.constant 0 : i32
    %c0_i32_1 = arith.constant 0 : i32
    return %c0_i32, %c0_i32_0 : i32, i32
  }
  func.func @transform_3(%arg0: i32) -> (i32, i32) {
    %c0_i32 = arith.constant 0 : i32
    %c0_i32_0 = arith.constant 0 : i32
    %c0_i32_1 = arith.constant 0 : i32
    return %c0_i32, %c0_i32_0 : i32, i32
  }
  func.func @transform_4(%arg0: i32) -> (i32, i32) {
    %c0_i32 = arith.constant 0 : i32
    %c0_i32_0 = arith.constant 0 : i32
    %c0_i32_1 = arith.constant 0 : i32
    return %c0_i32, %c0_i32_0 : i32, i32
  }
  func.func @transform_5(%arg0: i32) -> (i32, i32) {
    %c0_i32 = arith.constant 0 : i32
    %c0_i32_0 = arith.constant 0 : i32
    %c0_i32_1 = arith.constant 0 : i32
    return %c0_i32, %c0_i32_0 : i32, i32
  }
  func.func @transform_6(%arg0: i32) -> (i32, i32) {
    %c0_i32 = arith.constant 0 : i32
    %c0_i32_0 = arith.constant 0 : i32
    %c0_i32_1 = arith.constant 0 : i32
    return %c0_i32, %c0_i32_0 : i32, i32
  }
  func.func @transform_7(%arg0: i32) -> (i32, i32) {
    %c0_i32 = arith.constant 0 : i32
    %c0_i32_0 = arith.constant 0 : i32
    %c0_i32_1 = arith.constant 0 : i32
    return %c0_i32, %c0_i32_0 : i32, i32
  }
  func.func @transform_8(%arg0: i32) -> (i32, i32) {
    %c0_i32 = arith.constant 0 : i32
    %c0_i32_0 = arith.constant 0 : i32
    %c0_i32_1 = arith.constant 0 : i32
    return %c0_i32, %c0_i32_0 : i32, i32
  }
  func.func @transform_9(%arg0: i32) -> (i32, i32) {
    %c0_i32 = arith.constant 0 : i32
    %c0_i32_0 = arith.constant 0 : i32
    return %c0_i32, %arg0 : i32, i32
  }
}

</mosaic_0001>

<bundles_post_ra>
// kernel: tpu_custom_call.1
= control target key start
LH: loop header
LB: loop body
LE: loop exit
PB: predicated region body
PF: predicated region fallthrough
CT: control target
= control target key end

     0   :  { %s919_s0 = inlined_call_operand.vmem [shape: f32[16,128], index: 0, kind: input, shape index: {}]   ;;  %s920_s1 = inlined_call_operand.hbm [shape: f32[128,256], index: 1, kind: input, shape index: {}]   ;;  %s921_s2 = inlined_call_operand.vmem [shape: f32[1,256], index: 2, kind: input, shape index: {}]   ;;  %s922_s3 = inlined_call_operand.hbm [shape: f32[256,128], index: 3, kind: input, shape index: {}]   ;;  %s923_s4 = inlined_call_operand.vmem [shape: f32[1,128], index: 4, kind: input, shape index: {}]   ;;  %s924_s5 = inlined_call_operand.vmem [shape: f32[128,64], index: 5, kind: input, shape index: {}]   ;;  %s925_s6 = inlined_call_operand.vmem [shape: f32[1,64], index: 6, kind: input, shape index: {}]   ;;  %s926_s7 = inlined_call_operand.vmem [shape: f32[1,64], index: 7, kind: input, shape index: {}]   ;;  %s927_s8 = inlined_call_operand.<no memory space> [shape: f32[1,1], index: 8, kind: input, shape index: {}]   ;;  %s928_s9 = inlined_call_operand.hbm [shape: f32[1,16], index: 9, kind: output, shape index: {}]  }
   0x1   :  { %v14_v0 = vstv %s927_s8 }
   0x2   :  { %15 = vst [vmem:[#allocation2] sm:$0x1] %v14_v0 }
   0x3   :  { %16 = vsyncpa [#allocation4], 0 }
   0x4   :  { %17 = vsyncpa [#allocation7], 0 }
   0x5   :  { %18 = vsyncpa [#allocation5], 0  ;;  %s741_s11 = smov [#allocation3]   ;;  %s669_s15 = scalar_lea.hbm %s920_s1, 4096 }
   0x6   :  { %s26_s12 = sshll.u32 %s741_s11, 4  ;;  %p670_p0 = scmp.ne.s32.totalorder %s920_s1, %s669_s15  ;;  %s27_s12 = int_to_ptr.vmem [resolvable:$true] %s26_s12 }
   0x7   :  { %p673_p1 = scmp.lt.u32.totalorder %s669_s15, %s920_s1 }
   0x9   :  { %p675_p2 = pnand %p673_p1, %p670_p0 }
   0xb   :  { %678 = shalt.err (!%p675_p2)
}
   0xc   :  { %s679_s8 = scalar_lea.vmem %s27_s12, 4096  ;;  %p684_p4 = scmp.lt.s32.totalorder %s27_s12, %s27_s12 }
   0xd   :  { %p680_p3 = scmp.ne.s32.totalorder %s27_s12, %s679_s8  ;;  %p685_p5 = scmp.lt.s32.totalorder %s679_s8, %s679_s8 }
   0xf   :  { %p686_p6 = por %p685_p5, %p684_p4 }
  0x11   :  { %p687_p7 = pnand %p686_p6, %p680_p3 }
  0x13   :  { %690 = shalt.err (!%p687_p7)
}
  0x14   :  { %s742_s20 = smov 256   ;;  %s743_s21 = smov 16  }
  0x15   :  { %32 = dma.hbm_to_vmem [thread:$0]  %s920_s1, 4096, %s27_s12, [#allocation4], %s742_s20, %s742_s20, %s743_s21  }
  0x16   :  { %s744_s24 = smov [#allocation6]   ;;  %s691_s28 = scalar_lea.hbm %s922_s3, 4096 }
  0x17   :  { %s40_s25 = sshll.u32 %s744_s24, 4  ;;  %p692_p8 = scmp.ne.s32.totalorder %s922_s3, %s691_s28  ;;  %s41_s25 = int_to_ptr.vmem [resolvable:$true] %s40_s25 }
  0x18   :  { %p695_p9 = scmp.lt.u32.totalorder %s691_s28, %s922_s3 }
  0x1a   :  { %p697_p10 = pnand %p695_p9, %p692_p8 }
  0x1c   :  { %700 = shalt.err (!%p697_p10)
}
  0x1d   :  { %s701_s13 = scalar_lea.vmem %s41_s25, 4096  ;;  %p706_p12 = scmp.lt.s32.totalorder %s41_s25, %s41_s25 }
  0x1e   :  { %p702_p11 = scmp.ne.s32.totalorder %s41_s25, %s701_s13  ;;  %p707_p13 = scmp.lt.s32.totalorder %s701_s13, %s701_s13 }
  0x20   :  { %p708_p0 = por %p707_p13, %p706_p12 }
  0x22   :  { %p709_p1 = pnand %p708_p0, %p702_p11 }
  0x24   :  { %712 = shalt.err (!%p709_p1)
}
  0x25   :  { %s745_s1 = smov 128   ;;  %s746_s12 = smov 8  }
  0x26   :  { %46 = dma.hbm_to_vmem [thread:$0]  %s922_s3, 4096, %s41_s25, [#allocation7], %s745_s1, %s745_s1, %s746_s12  }
  0x27   :  { %735 = dma.done.wait [#allocation4], 4096  }
  0x28   :  { %736 = vsyncadd [#allocation4], 4294963200 }
  0x29   :  { %737 = dma.done.wait [#allocation7], 4096  }
  0x2a   :  { %738 = vsyncadd [#allocation7], 4294963200  ;;  %v747_v1 = vmov 0.0   ;;  %v66_v2 = vld [vmem:[#allocation3 + $0x8] sm:$0xff]  ;;  %v68_v3 = vld [vmem:[#allocation3 + $0x18] sm:$0xff]  ;;  %vm415_vm0 = vcmask 523264  }
  0x2b   :  { %173 = vmatprep.mubr.f32.mxu0 %v747_v1  ;;  %v65_v4 = vld [vmem:[#allocation3] sm:$0xff]  ;;  %v562_v5 = vpack.c.bf16 %v68_v3, %v66_v2  ;;  %v67_v6 = vld [vmem:[#allocation3 + $0x10] sm:$0xff]  ;;  %v70_v7 = vld [vmem:[#allocation3 + $0x28] sm:$0xff]  ;;  %vm447_vm1 = vcmask 130112   ;;  %vm450_vm2 = vcmask 122880  }
  0x2c   :  { %v72_v8 = vld [vmem:[#allocation3 + $0x38] sm:$0xff]  ;;  %v564_v9 = vpack.c.bf16 %v67_v6, %v65_v4  ;;  %v69_v11 = vld [vmem:[#allocation3 + $0x20] sm:$0xff]  ;;  %v71_v12 = vld [vmem:[#allocation3 + $0x30] sm:$0xff] }
  0x2d   :  { %v566_v10 = vpack.c.bf16 %v72_v8, %v70_v7  ;;  %v74_v13 = vld [vmem:[#allocation3 + $0x48] sm:$0xff]  ;;  %563 = vmatprep.subr.bf16.mxu0 %v562_v5  ;;  %v76_v14 = vld [vmem:[#allocation3 + $0x58] sm:$0xff]  ;;  %v568_v15 = vpack.c.bf16 %v71_v12, %v69_v11  ;;  %v73_v17 = vld [vmem:[#allocation3 + $0x40] sm:$0xff] }
  0x2e   :  { %565 = vmatpush1.bf16.msra.mxu0 %v564_v9  ;;  %v570_v16 = vpack.c.bf16 %v76_v14, %v74_v13  ;;  %v75_v18 = vld [vmem:[#allocation3 + $0x50] sm:$0xff]  ;;  %v78_v19 = vld [vmem:[#allocation3 + $0x68] sm:$0xff]  ;;  %v80_v20 = vld [vmem:[#allocation3 + $0x78] sm:$0xff] }
  0x2f   :  { %567 = vmatprep.subr.bf16.mxu0 %v566_v10  ;;  %v572_v21 = vpack.c.bf16 %v75_v18, %v73_v17  ;;  %v574_v22 = vpack.c.bf16 %v80_v20, %v78_v19  ;;  %v77_v23 = vld [vmem:[#allocation3 + $0x60] sm:$0xff]  ;;  %v79_v24 = vld [vmem:[#allocation3 + $0x70] sm:$0xff]  ;;  %v82_v25 = vld [vmem:[#allocation3 + $0x88] sm:$0xff] }
  0x30   :  { %v84_v26 = vld [vmem:[#allocation3 + $0x98] sm:$0xff]  ;;  %v81_v27 = vld [vmem:[#allocation3 + $0x80] sm:$0xff]  ;;  %v83_v28 = vld [vmem:[#allocation3 + $0x90] sm:$0xff]  ;;  %v576_v31 = vpack.c.bf16 %v79_v24, %v77_v23 }
  0x31   :  { %v206_v29 = vld [vmem:[#allocation6 + $0x80] sm:$0xff]  ;;  %v207_v30 = vld [vmem:[#allocation6 + $0x88] sm:$0xff]  ;;  %v208_v36 = vld [vmem:[#allocation6 + $0x90] sm:$0xff]  ;;  %v578_v37 = vpack.c.bf16 %v84_v26, %v82_v25  ;;  %v580_v47 = vpack.c.bf16 %v83_v28, %v81_v27 }
  0x32   :  { %569 = vmatpush1.bf16.msra.mxu0 %v568_v15  ;;  %v86_v32 = vld [vmem:[#allocation3 + $0xa8] sm:$0xff]  ;;  %v594_v33 = vpack.c.bf16 %v207_v30, %v206_v29  ;;  %v190_v34 = vld [vmem:[#allocation6] sm:$0xff]  ;;  %v209_v39 = vld [vmem:[#allocation6 + $0x98] sm:$0xff] }
  0x33   :  { %571 = vmatprep.subr.bf16.mxu0 %v570_v16  ;;  %v191_v35 = vld [vmem:[#allocation6 + $0x8] sm:$0xff]  ;;  %v192_v40 = vld [vmem:[#allocation6 + $0x10] sm:$0xff]  ;;  %v193_v41 = vld [vmem:[#allocation6 + $0x18] sm:$0xff]  ;;  %v598_v43 = vpack.c.bf16 %v209_v39, %v208_v36 }
  0x34   :  { %v596_v38 = vpack.c.bf16 %v191_v35, %v190_v34  ;;  %v88_v42 = vld [vmem:[#allocation3 + $0xb8] sm:$0xff]  ;;  %595 = vmatprep.subr.bf16.mxu1 %v594_v33  ;;  %v210_v44 = vld [vmem:[#allocation6 + $0xa0] sm:$0xff]  ;;  %v211_v45 = vld [vmem:[#allocation6 + $0xa8] sm:$0xff]  ;;  %v600_v46 = vpack.c.bf16 %v193_v41, %v192_v40 }
  0x35   :  { %v85_v48 = vld [vmem:[#allocation3 + $0xa0] sm:$0xff]  ;;  %v602_v49 = vpack.c.bf16 %v211_v45, %v210_v44  ;;  %v195_v51 = vld [vmem:[#allocation6 + $0x28] sm:$0xff]  ;;  %v582_v52 = vpack.c.bf16 %v88_v42, %v86_v32  ;;  %v87_v53 = vld [vmem:[#allocation3 + $0xb0] sm:$0xff] }
  0x36   :  { %573 = vmatpush1.bf16.msra.mxu0 %v572_v21  ;;  %597 = vmatpush3.bf16.msra.mxu1 %v596_v38  ;;  %v194_v50 = vld [vmem:[#allocation6 + $0x20] sm:$0xff]  ;;  %v212_v54 = vld [vmem:[#allocation6 + $0xb0] sm:$0xff]  ;;  %v213_v55 = vld [vmem:[#allocation6 + $0xb8] sm:$0xff]  ;;  %v584_v59 = vpack.c.bf16 %v87_v53, %v85_v48 }
  0x37   :  { %575 = vmatprep.subr.bf16.mxu0 %v574_v22  ;;  %599 = vmatprep.subr.bf16.mxu1 %v598_v43  ;;  %v90_v56 = vld [vmem:[#allocation3 + $0xc8] sm:$0xff]  ;;  %v92_v57 = vld [vmem:[#allocation3 + $0xd8] sm:$0xff]  ;;  %v604_v58 = vpack.c.bf16 %v195_v51, %v194_v50  ;;  %v89_v60 = vld [vmem:[#allocation3 + $0xc0] sm:$0xff]  ;;  %v606_v61 = vpack.c.bf16 %v213_v55, %v212_v54  ;;  %v99_v51 = vlaneseq }
  0x38   :  { %v196_v62 = vld [vmem:[#allocation6 + $0x30] sm:$0xff]  ;;  %v197_v63 = vld [vmem:[#allocation6 + $0x38] sm:$0xff]  ;;  %v586_v0 = vpack.c.bf16 %v92_v57, %v90_v56  ;;  %v214_v3 = vld [vmem:[#allocation6 + $0xc0] sm:$0xff] }
  0x39   :  { %v91_v2 = vld [vmem:[#allocation3 + $0xd0] sm:$0xff]  ;;  %v215_v4 = vld [vmem:[#allocation6 + $0xc8] sm:$0xff]  ;;  %v96_v6 = vld [vmem:[#allocation3 + $0xf8] sm:$0xff]  ;;  %v608_v7 = vpack.c.bf16 %v197_v63, %v196_v62 }
  0x3a   :  { %577 = vmatpush1.bf16.msra.mxu0 %v576_v31  ;;  %601 = vmatpush3.bf16.msra.mxu1 %v600_v46  ;;  %v94_v5 = vld [vmem:[#allocation3 + $0xe8] sm:$0xff]  ;;  %v588_v8 = vpack.c.bf16 %v91_v2, %v89_v60  ;;  %v93_v9 = vld [vmem:[#allocation3 + $0xe0] sm:$0xff]  ;;  %v610_v10 = vpack.c.bf16 %v215_v4, %v214_v3  ;;  %v95_v14 = vld [vmem:[#allocation3 + $0xf0] sm:$0xff] }
  0x3b   :  { %579 = vmatprep.subr.bf16.mxu0 %v578_v37  ;;  %603 = vmatprep.subr.bf16.mxu1 %v602_v49  ;;  %v198_v11 = vld [vmem:[#allocation6 + $0x40] sm:$0xff]  ;;  %v199_v12 = vld [vmem:[#allocation6 + $0x48] sm:$0xff]  ;;  %v590_v13 = vpack.c.bf16 %v96_v6, %v94_v5  ;;  %v216_v15 = vld [vmem:[#allocation6 + $0xd0] sm:$0xff]  ;;  %v592_v18 = vpack.c.bf16 %v95_v14, %v93_v9 }
  0x3c   :  { %v217_v16 = vld [vmem:[#allocation6 + $0xd8] sm:$0xff]  ;;  %v612_v17 = vpack.c.bf16 %v199_v12, %v198_v11  ;;  %v200_v20 = vld [vmem:[#allocation6 + $0x50] sm:$0xff]  ;;  %v218_v22 = vld [vmem:[#allocation6 + $0xe0] sm:$0xff] }
  0x3d   :  { %v614_v19 = vpack.c.bf16 %v217_v16, %v216_v15  ;;  %v201_v21 = vld [vmem:[#allocation6 + $0x58] sm:$0xff]  ;;  %v219_v23 = vld [vmem:[#allocation6 + $0xe8] sm:$0xff]  ;;  %v202_v28 = vld [vmem:[#allocation6 + $0x60] sm:$0xff] }
  0x3e   :  { %581 = vmatpush1.bf16.msra.mxu0 %v580_v47  ;;  %605 = vmatpush3.bf16.msra.mxu1 %v604_v58  ;;  %v616_v24 = vpack.c.bf16 %v201_v21, %v200_v20  ;;  %v63_v25 = vld [vmem:[%s919_s0] sm:$0xff]  ;;  %v618_v26 = vpack.c.bf16 %v219_v23, %v218_v22  ;;  %v64_v27 = vld [vmem:[%s919_s0 + $0x8] sm:$0xff]  ;;  %v220_v31 = vld [vmem:[#allocation6 + $0xf0] sm:$0xff] }
  0x3f   :  { %583 = vmatprep.subr.bf16.mxu0 %v582_v52  ;;  %607 = vmatprep.subr.bf16.mxu1 %v606_v61  ;;  %v203_v29 = vld [vmem:[#allocation6 + $0x68] sm:$0xff]  ;;  %v221_v32 = vld [vmem:[#allocation6 + $0xf8] sm:$0xff]  ;;  %v204_v34 = vld [vmem:[#allocation6 + $0x70] sm:$0xff]  ;;  %v866_v52 = vshrl.u32 %v99_v51, 7 }
  0x40   :  { %v620_v30 = vpack.c.bf16 %v203_v29, %v202_v28  ;;  %v622_v33 = vpack.c.bf16 %v221_v32, %v220_v31  ;;  %v205_v35 = vld [vmem:[#allocation6 + $0x78] sm:$0xff]  ;;  %v307_v37 = vld [vmem:[%s924_s5 + $0x8] sm:$0xff]  ;;  %v308_v38 = vld [vmem:[%s924_s5 + $0x10] sm:$0xff]  ;;  %v748_v28 = vmov 0  }
  0x41   :  { %v624_v36 = vpack.c.bf16 %v205_v35, %v204_v34  ;;  %v309_v40 = vld [vmem:[%s924_s5 + $0x18] sm:$0xff]  ;;  %v310_v42 = vld [vmem:[%s924_s5 + $0x20] sm:$0xff]  ;;  %v311_v43 = vld [vmem:[%s924_s5 + $0x28] sm:$0xff]  ;;  %v101_v53 = vsub.s32 0, %v866_v52  ;;  %v105_v55 = vsub.s32 1, %v866_v52  ;;  %667 = vset.pattern.permute.xlu1 %v748_v28  ;;  %668 = vset.pattern.permute.xlu0 %v748_v28 }
  0x42   :  { %585 = vmatpush1.bf16.msra.mxu0 %v584_v59  ;;  %609 = vmatpush3.bf16.msra.mxu1 %v608_v7  ;;  %v630_v41 = vpack.c.bf16 %v309_v40, %v308_v38  ;;  %v634_v44 = vpack.c.bf16 %v311_v43, %v310_v42  ;;  %v312_v45 = vld [vmem:[%s924_s5 + $0x30] sm:$0xff]  ;;  %v313_v46 = vld [vmem:[%s924_s5 + $0x38] sm:$0xff]  ;;  %v314_v48 = vld [vmem:[%s924_s5 + $0x40] sm:$0xff] }
  0x43   :  { %587 = vmatprep.subr.bf16.mxu0 %v586_v0  ;;  %611 = vmatprep.subr.bf16.mxu1 %v610_v10  ;;  %v638_v47 = vpack.c.bf16 %v313_v46, %v312_v45  ;;  %v315_v49 = vld [vmem:[%s924_s5 + $0x48] sm:$0xff]  ;;  %v97_v54 = vld [vmem:[%s921_s2] sm:$0x3]  ;;  %v316_v7 = vld [vmem:[%s924_s5 + $0x50] sm:$0xff] }
  0x44   :  { %v642_v50 = vpack.c.bf16 %v315_v49, %v314_v48  ;;  %v102_v56 = vrot.slane %v97_v54, %v101_v53  ;;  %v106_v57 = vrot.slane %v97_v54, %v105_v55  ;;  %v318_v10 = vld [vmem:[%s924_s5 + $0x60] sm:$0xff]  ;;  %v319_v11 = vld [vmem:[%s924_s5 + $0x68] sm:$0xff]  ;;  %v321_v14 = vld [vmem:[%s924_s5 + $0x78] sm:$0xff] }
  0x45   :  { %v650_v12 = vpack.c.bf16 %v319_v11, %v318_v10  ;;  %v469_v29 = vld [vmem:[%s925_s6] ss:$0 sm:$0xff]  ;;  %s749_s6 = smov [#allocation8]  }
  0x46   :  { %589 = vmatpush1.bf16.msra.mxu0 %v588_v8  ;;  %613 = vmatpush3.bf16.msra.mxu1 %v612_v17  ;;  %v317_v8 = vld [vmem:[%s924_s5 + $0x58] sm:$0xff]  ;;  %v468_v17 = vld [vmem:[%s923_s4] ss:$0 sm:$0xff] }
  0x47   :  { %591 = vmatprep.subr.bf16.mxu0 %v590_v13  ;;  %615 = vmatprep.subr.bf16.mxu1 %v614_v19  ;;  %v646_v9 = vpack.c.bf16 %v317_v8, %v316_v7  ;;  %v320_v13 = vld [vmem:[%s924_s5 + $0x70] sm:$0xff]  ;;  %v470_v34 = vld [vmem:[%s926_s7] ss:$0 sm:$0xff]  ;;  %s458_s7 = sshll.u32 %s749_s6, 4  ;;  %s459_s7 = int_to_ptr.vmem [resolvable:$true] %s458_s7 }
  0x48   :  { %v654_v15 = vpack.c.bf16 %v321_v14, %v320_v13  ;;  %s713_s29 = scalar_lea.vmem %s459_s7, 16  ;;  %s717_s30 = scalar_lea.vmem %s459_s7, 32 }
  0x49   :  { %p714_p2 = scmp.ne.s32.totalorder %s459_s7, %s713_s29  ;;  %p718_p3 = scmp.lt.s32.totalorder %s459_s7, %s459_s7 }
  0x4a   :  { %593 = vmatpush1.bf16.msra.mxu0 %v592_v18  ;;  %617 = vmatpush3.bf16.msra.mxu1 %v616_v24  ;;  %p719_p4 = scmp.lt.s32.totalorder %s717_s30, %s713_s29 }
  0x4b   :  { %619 = vmatprep.subr.bf16.mxu1 %v618_v26 }
  0x4c   :  { %p720_p5 = por %p719_p4, %p718_p3 }
  0x4d   :  { %174 = vmatmul.mubr.f32.vlgmr.msra.gmra.mrb[0].mxu0 %v63_v25 }
  0x4e   :  { %179 = vmatprep.mubr.f32.mxu0 %v747_v1  ;;  %621 = vmatpush3.bf16.msra.mxu1 %v620_v30  ;;  %v306_v1 = vld [vmem:[%s924_s5] sm:$0xff]  ;;  %p721_p6 = pnand %p720_p5, %p714_p2 }
  0x4f   :  { %623 = vmatprep.subr.bf16.mxu1 %v622_v33  ;;  %v626_v39 = vpack.c.bf16 %v307_v37, %v306_v1 }
  0x51   :  { %180 = vmatmul.mubr.f32.gmra.mrb[2].mxu0 %v64_v27  ;;  %627 = vmatprep.subr.bf16.mxu0 %v626_v39  ;;  %v422_v27 = vld [vmem:[#allocation2] sm:$0x1] }
  0x52   :  { %625 = vmatpush3.bf16.msra.mxu1 %v624_v36  ;;  %629 = vmatpush3.bf16.msra.mxu0 %v626_v39 }
  0x53   :  { %631 = vmatprep.subr.bf16.mxu0 %v630_v41  ;;  %425 = vperm.xlu1 %667, %v422_v27  }
  0x56   :  { %633 = vmatpush3.bf16.msra.mxu0 %v630_v41  ;;  %v437_v41 = vand.u32 127, %v99_v51 }
  0x57   :  { %635 = vmatprep.subr.bf16.mxu0 %v634_v44 }
  0x58   :  { %v442_v43 = vadd.s32 4294967288, %v437_v41  ;;  %v440_v45 = vsub.s32 %v437_v41, %v866_v52 }
  0x5a   :  { %637 = vmatpush3.bf16.msra.mxu0 %v634_v44 }
  0x5b   :  { %639 = vmatprep.subr.bf16.mxu0 %v638_v47 }
  0x5e   :  { %641 = vmatpush3.bf16.msra.mxu0 %v638_v47  ;;  %v445_v47 = vsub.s32 %v442_v43, %v866_v52 }
  0x5f   :  { %643 = vmatprep.subr.bf16.mxu0 %v642_v50 }
  0x62   :  { %645 = vmatpush3.bf16.msra.mxu0 %v642_v50 }
  0x63   :  { %647 = vmatprep.subr.bf16.mxu0 %v646_v9 }
  0x66   :  { %649 = vmatpush3.bf16.msra.mxu0 %v646_v9 }
  0x67   :  { %651 = vmatprep.subr.bf16.mxu0 %v650_v12 }
  0x6a   :  { %653 = vmatpush3.bf16.msra.mxu0 %v650_v12 }
  0x6b   :  { %655 = vmatprep.subr.bf16.mxu0 %v654_v15 }
  0x6e   :  { %657 = vmatpush3.bf16.msra.mxu0 %v654_v15 }
  0xd2   :  { %v426_v40 = vpop.permute.xlu1 %425 }
  0xd3   :  { %v431_v42 = vrot.slane %v426_v40, %v101_v53 }
 0x120   :  { %v175_v58 = vpop.f32.mrb[0].mxu0 }
 0x121   :  { %v176_v59 = vadd.f32 %v175_v58, %v102_v56  ;;  %v177_v60 = vpop.f32.mrb[1].mxu0 }
 0x122   :  { %v178_v61 = vadd.f32 %v177_v60, %v106_v57 }
 0x123   :  { %v186_v0 = vmax.f32 %v176_v59, 0.0 }
 0x124   :  { %v181_v62 = vpop.f32.mrb[2].mxu0  ;;  %v187_v63 = vmax.f32 %v178_v61, 0.0 }
 0x125   :  { %v182_v2 = vadd.f32 %v181_v62, %v102_v56  ;;  %v183_v3 = vpop.f32.mrb[3].mxu0 }
 0x126   :  { %v184_v4 = vadd.f32 %v183_v3, %v106_v57  ;;  %293 = vmatprep.mubr.f32.mxu1 %v187_v63 }
 0x127   :  { %294 = vmatmul.mubr.f32.vlgmr.msra.gmra.mrb[0].mxu1 %v186_v0  ;;  %v188_v6 = vmax.f32 %v182_v2, 0.0 }
 0x128   :  { %v189_v5 = vmax.f32 %v184_v4, 0.0 }
 0x12a   :  { %298 = vmatprep.mubr.f32.mxu1 %v189_v5 }
 0x12b   :  { %299 = vmatmul.mubr.f32.gmra.mrb[2].mxu1 %v188_v6 }
 0x1fa   :  { %v503_v16 = vpop.f32.mrb[0].mxu1 }
 0x1fb   :  { %v504_v18 = vpop.f32.mrb[1].mxu1 }
 0x1fc   :  { %v505_v19 = vadd.f32 %v504_v18, %v503_v16 }
 0x1fe   :  { %v296_v20 = vadd.f32 %v505_v19, %v468_v17  ;;  %v506_v21 = vpop.f32.mrb[2].mxu1 }
 0x1ff   :  { %v507_v22 = vpop.f32.mrb[3].mxu1 }
 0x200   :  { %v304_v23 = vmax.f32 %v296_v20, 0.0  ;;  %v508_v24 = vadd.f32 %v507_v22, %v506_v21 }
 0x202   :  { %v301_v25 = vadd.f32 %v508_v24, %v468_v17  ;;  %559 = vmatprep.mubr.f32.mxu0 %v304_v23 }
 0x204   :  { %v305_v26 = vmax.f32 %v301_v25, 0.0 }
 0x206   :  { %560 = vmatmul.mubr.f32.vlgmr.msra.gmra.mrb[4].mxu0 %v305_v26 }
 0x2d9   :  { %v561_v30 = vpop.f32.mrb[4].mxu0 }
 0x2da   :  { %v401_v31 = vadd.f32 %v561_v30, %v469_v29  ;;  %v395_v32 = vpop.f32.mrb[5].mxu0 }
 0x2db   :  { %v396_v33 = vadd.f32 %v469_v29, %v395_v32 }
 0x2dc   :  { %v405_v35 = vmax.f32 %v401_v31, 0.0 }
 0x2dd   :  { %v404_v36 = vmax.f32 %v396_v33, 0.0 }
 0x2de   :  { %v414_v38 = vmul.f32 %v470_v34, %v405_v35 }
 0x2df   :  { %v413_v1 = vmul.f32 %v470_v34, %v404_v36 }
 0x2e0   :  { %v419_v39 = vsel %vm415_vm0, %v414_v38, 0.0 }
 0x2e1   :  { %v416_v37 = vsel %vm415_vm0, %v413_v1, 0.0 }
 0x2e2   :  { %417 = vadd.xlane.f32.xlu0 %v416_v37 }
 0x2e6   :  { %420 = vadd.xlane.f32.xlu0 %v419_v39 }
 0x36f   :  { %v418_v44 = vpop.xlane.xlu0 %417 }
 0x370   :  { %v432_v46 = vadd.f32 %v431_v42, %v418_v44 }
 0x372   :  { %v441_v50 = vrot.slane %v432_v46, %v440_v45 }
 0x373   :  { %v421_v48 = vpop.xlane.xlu0 %420 }
 0x374   :  { %v433_v49 = vadd.f32 %v431_v42, %v421_v48 }
 0x376   :  { %v446_v54 = vrot.slane %v433_v49, %v445_v47 }
 0x378   :  { %v448_v51 = vsel %vm447_vm1, %v446_v54, %v441_v50 }
 0x379   :  { %451 = vst.msk [vmem:[#allocation8] sm:$0x1] %vm450_vm2, %v448_v51 }
 0x37a   :  { %724 = shalt.err (!%p721_p6)
}
 0x37b   :  { %s725_s13 = scalar_lea.hbm %s928_s9, 16 }
 0x37c   :  { %p726_p7 = scmp.ne.s32.totalorder %s928_s9, %s725_s13  ;;  %p729_p8 = scmp.lt.u32.totalorder %s725_s13, %s928_s9 }
 0x37e   :  { %p731_p9 = pnand %p729_p8, %p726_p7 }
 0x380   :  { %734 = shalt.err (!%p731_p9)
}
 0x381   :  { %461 = dma.vmem_to_hbm [thread:$0]  %s459_s7, 16, %s928_s9, [#allocation5]  }
 0x382   :  { %739 = dma.done.wait [#allocation5], 16  }
 0x383   :  { %740 = vsyncadd [#allocation5], 4294967280 }
 0x384   :  { %465 = vsyncpa [#allocation4], 1 }
 0x385   :  { %466 = vsyncpa [#allocation7], 1 }
 0x386   :  { %467 = vsyncpa [#allocation5], 1 }

</bundles_post_ra>
